<compile_context>
chip_gen: v5e
topology: v5e:2x2
jax: 0.10.0
libtpu: 0.0.40
codegen_flags: <defaults>
</compile_context>

<pallas_src>
import functools

import jax
import jax.numpy as jnp
from jax.experimental import pallas as pl
from jax.experimental.pallas import tpu as pltpu


_LANE = 128     # lane width: hidden/output feature dims padded to a multiple of this
_SUBLANE = 8    # f32 sublane count: batch padded to a multiple of this


def _round_up(n, m):
    return ((n + m - 1) // m) * m


def _cdiv(a, b):
    return -(-a // b)


def _vmem_budgets():
    """Generation-aware VMEM sizing (v7x: 64 MiB/TC, v5e/v6e: 128 MiB)."""
    cap = 64 * 1024 * 1024  # conservative fallback if the query is unavailable
    try:
        cap = int(pltpu.get_tpu_info().vmem_capacity_bytes)
    except Exception:
        pass
    working_set_budget = cap // 2       # 32 MiB on v7x, 64 MiB on v5e/v6e
    vmem_limit_bytes = (cap * 3) // 4   # 48 MiB on v7x, 96 MiB on v5e/v6e
    return working_set_budget, vmem_limit_bytes


def _apply_activation(y, act):
    """Post-matmul activation, computed in f32 on the VPU/EUP."""
    if act == "ReLU":
        return jnp.maximum(y, 0.0)
    if act == "ELU":  # alpha = 1.0 (PyTorch default); expm1 for accuracy near 0
        return jnp.where(y > 0, y, jnp.expm1(jnp.minimum(y, 0.0)))
    if act == "Tanh":
        return jnp.tanh(y)
    if act == "Sigmoid":
        return jax.nn.sigmoid(y)
    if act == "LeakyReLU":  # negative_slope = 0.01 (PyTorch default)
        return jnp.where(y > 0, y, 0.01 * y)
    if act == "Hardtanh":
        return jnp.clip(y, -1.0, 1.0)
    if act == "GELU":
        return jax.nn.gelu(y, approximate=False)  # PyTorch default is exact erf
    # TODO(synk): remaining torch.nn activations can be added here as needed.
    raise NotImplementedError(f"activation {act!r} not implemented")


def _mlp_fused_kernel(*refs, n_layers, act, mxu_dtype):
    """Whole MLP forward for one batch tile, fully resident in VMEM.

    refs = (x_ref, w0_ref, b0_ref, w1_ref, b1_ref, ..., o_ref)
      x_ref : (Bt, d_in)          input dtype (f32 or bf16), true feature width
      wL    : (KL, DL+1_p)        mxu_dtype (bf16); K of layer 0 is the true d_in
      bL    : (1, DL+1_p)         f32
      o_ref : (Bt, Dlast_p)       output dtype
    """
    x_ref = refs[0]
    o_ref = refs[-1]
    p_refs = refs[1:-1]

    x = x_ref[...]  # native dtype; cast only to the MXU dtype per matmul
    for layer in range(n_layers):
        w = p_refs[2 * layer][...]
        b = p_refs[2 * layer + 1][...]
        # MXU matmul with bf16 inputs, f32 accumulation.
        y = jnp.dot(x.astype(mxu_dtype), w.astype(mxu_dtype),
                    preferred_element_type=jnp.float32)
        y = y + b.astype(jnp.float32)
        x = _apply_activation(y, act)  # epilogue stays in f32
    o_ref[...] = x.astype(o_ref.dtype)


def _pick_block_b(b8, d_in, max_hidden, d_out_p, param_bytes,
                  x_itemsize, out_itemsize, budget):
    """Largest batch tile (multiple of 8, <= b8) whose working set fits `budget`."""
    for cand in (4096, 2048, 1024, 512, 256, 128, 64, 32, 16, 8):
        bb = min(cand, b8)
        need = (2 * param_bytes                      # double-buffered weights/biases
                + 2 * bb * d_in * x_itemsize         # double-buffered input tile
                + 2 * bb * d_out_p * out_itemsize    # double-buffered output tile
                + 3 * bb * max_hidden * 4            # live f32 intermediates
                + bb * max_hidden * 2)               # bf16 matmul copies
        if need <= budget:
            return bb
    # TODO(synk): if param_bytes alone approaches the budget, stream weights
    # layer-by-layer (second grid axis / pltpu.emit_pipeline) instead of
    # degrading to 8-row batch tiles.
    return _SUBLANE


def mlp_forward(x, params, dims, *, act, mxu_dtype=jnp.bfloat16, out_dtype=None):
    """Fused MLP forward. x: (batch, dims[0]); params: list of (w, b) pairs."""
    batch, d_in = x.shape
    assert d_in == dims[0]
    n_layers = len(params)
    out_dtype = x.dtype if out_dtype is None else jnp.dtype(out_dtype)

    flat_params = []
    for w, b in params:
        flat_params.extend((w, b))
    param_bytes = sum(int(a.size) * a.dtype.itemsize for a in flat_params)
    hidden_p = [w.shape[1] for w, _ in params]  # lane-padded per-layer output widths
    d_out_p = hidden_p[-1]
    max_hidden = max(hidden_p)

    budget, vmem_limit = _vmem_budgets()

    # --- batch tiling: pad only to the 8-row quantum, not to a block_b multiple ---
    b8 = _round_up(max(batch, 1), _SUBLANE)
    block_b = _pick_block_b(b8, d_in, max_hidden, d_out_p, param_bytes,
                            x.dtype.itemsize, jnp.dtype(out_dtype).itemsize, budget)
    # Megacore (v7x): with >=1024 rows force at least 2 batch tiles so the
    # "parallel" axis can shard across both TensorCores (negligible cost on
    # single-TC v5e/v6e).
    if b8 >= 1024:
        block_b = min(block_b, _round_up(_cdiv(b8, 2), _SUBLANE))
    n_tiles = _cdiv(b8, block_b)
    block_b = _round_up(_cdiv(b8, n_tiles), _SUBLANE)  # even tiles, <= budgeted size
    b_pad = n_tiles * block_b

    # Batch-dim zero pad only when needed (feature dim stays at true d_in).
    x_p = x if b_pad == batch else jnp.zeros((b_pad, d_in), x.dtype).at[:batch].set(x)

    kernel = functools.partial(_mlp_fused_kernel, n_layers=n_layers, act=act,
                               mxu_dtype=mxu_dtype)
    out_shape = jax.ShapeDtypeStruct((b_pad, d_out_p), out_dtype)

    if n_tiles == 1:
        # Small-batch path: no grid -> whole problem resident in VMEM, no
        # pipeline / index-map bookkeeping.
        n_in = 1 + 2 * n_layers
        out_p = pl.pallas_call(
            kernel,
            out_shape=out_shape,
            in_specs=[pl.BlockSpec(memory_space=pltpu.MemorySpace.VMEM)] * n_in,
            out_specs=pl.BlockSpec(memory_space=pltpu.MemorySpace.VMEM),
            compiler_params=pltpu.CompilerParams(vmem_limit_bytes=vmem_limit),
        )(x_p, *flat_params)
    else:
        # Large-batch path: grid over batch tiles ("parallel" -> megacore
        # sharding on v7x). Weights/biases have constant index maps so they
        # stay resident and are not re-fetched per grid step.
        in_specs = [pl.BlockSpec((block_b, d_in), lambda i: (i, 0))]
        for w, b in params:
            in_specs.append(pl.BlockSpec(w.shape, lambda i: (0, 0)))
            in_specs.append(pl.BlockSpec(b.shape, lambda i: (0, 0)))
        out_specs = pl.BlockSpec((block_b, d_out_p), lambda i: (i, 0))
        out_p = pl.pallas_call(
            kernel,
            out_shape=out_shape,
            grid=(n_tiles,),
            in_specs=in_specs,
            out_specs=out_specs,
            compiler_params=pltpu.CompilerParams(
                dimension_semantics=("parallel",),
                vmem_limit_bytes=vmem_limit),
        )(x_p, *flat_params)

    return out_p[:batch, :dims[-1]]


class MLP:
    """JAX/Pallas port of SEPAL MLP: stack of Linear layers, activation after each.

    Weights are stored transposed ((in, out) = W.T) in bf16.  Hidden/output
    dims are zero-padded to 128-lane multiples; layer 0 keeps the TRUE input
    width on its K dim because the input itself is not feature-padded in HBM.
    Biases are (1, out_padded) in f32.
    """

    def __init__(self, layer_list, act, key, *, matmul_dtype=jnp.bfloat16):
        self.dims = list(layer_list)
        self.act = act
        self.matmul_dtype = matmul_dtype
        self.params = []
        for i in range(len(self.dims) - 1):
            fan_in, fan_out = self.dims[i], self.dims[i + 1]
            k_dim = fan_in if i == 0 else _round_up(fan_in, _LANE)
            n_dim = _round_up(fan_out, _LANE)
            key, kw, kb = jax.random.split(key, 3)
            bound = 1.0 / float(fan_in) ** 0.5
            # PyTorch nn.Linear default init: U(-1/sqrt(fan_in), 1/sqrt(fan_in))
            w = jax.random.uniform(kw, (fan_in, fan_out), jnp.float32, -bound, bound)
            b = jax.random.uniform(kb, (fan_out,), jnp.float32, -bound, bound)
            w_p = jnp.zeros((k_dim, n_dim), jnp.float32)
            w_p = w_p.at[:fan_in, :fan_out].set(w).astype(matmul_dtype)
            b_p = jnp.zeros((1, n_dim), jnp.float32).at[:, :fan_out].set(b)
            self.params.append((w_p, b_p))

    def __call__(self, expression, out_dtype=None):
        return mlp_forward(expression, self.params, self.dims,
                           act=self.act, mxu_dtype=self.matmul_dtype,
                           out_dtype=out_dtype)


if __name__ == "__main__":
    key = jax.random.PRNGKey(0)
    key, k_params, k1, k2, k3, k4 = jax.random.split(key, 6)

    layer_list = [32, 64, 48, 16]  # input -> hidden -> hidden -> output
    act = "ReLU"
    model = MLP(layer_list, act, k_params)

    def reference(x):
        # Same math in plain JAX (bf16 matmul inputs, f32 accumulate + epilogue).
        r = x
        for (w_p, b_p), din, dout in zip(model.params,
                                         model.dims[:-1], model.dims[1:]):
            w = w_p[:din, :dout]
            b = b_p[:, :dout]
            y = jnp.dot(r.astype(model.matmul_dtype), w.astype(model.matmul_dtype),
                        preferred_element_type=jnp.float32) + b
            r = jnp.maximum(y, 0.0)
        return r

    # 1) Small batch -> no-grid, fully VMEM-resident path.
    x_small = jax.random.normal(k1, (8, layer_list[0]), dtype=jnp.float32)
    out_small = jax.block_until_ready(model(x_small))
    assert out_small.shape == (8, layer_list[-1])
    assert out_small.dtype == jnp.float32
    assert jnp.allclose(out_small, reference(x_small), atol=1e-2, rtol=1e-2)

    # 2) Ragged batch -> padded only to the 8-row sublane quantum (single tile).
    x_rag = jax.random.normal(k2, (1001, layer_list[0]), dtype=jnp.float32)
    out_rag = jax.block_until_ready(model(x_rag))
    assert out_rag.shape == (1001, layer_list[-1])
    assert jnp.allclose(out_rag, reference(x_rag), atol=1e-2, rtol=1e-2)

    # 3) Larger batch -> >=2 even batch tiles on the "parallel" grid axis.
    x_big = jax.random.normal(k3, (2048, layer_list[0]), dtype=jnp.float32)
    out_big = jax.block_until_ready(model(x_big))
    assert out_big.shape == (2048, layer_list[-1])
    assert jnp.allclose(out_big, reference(x_big), atol=1e-2, rtol=1e-2)

    # 4) bf16 input / bf16 output path (no in-kernel f32 round-trip for x).
    x_bf16 = jax.random.normal(k4, (16, layer_list[0]), dtype=jnp.bfloat16)
    out_bf16 = jax.block_until_ready(model(x_bf16))
    assert out_bf16.shape == (16, layer_list[-1])
    assert out_bf16.dtype == jnp.bfloat16
    assert jnp.allclose(out_bf16.astype(jnp.float32),
                        reference(x_bf16.astype(jnp.float32)),
                        atol=5e-2, rtol=5e-2)

    print("KERNEL_OK")
</pallas_src>

<mosaic_0001>
module attributes {stable_mosaic.version = 11 : i64} {
  func.func @_mlp_fused_kernel(%arg0: memref<8x32xf32, #tpu.memory_space<vmem>>, %arg1: memref<32x128xbf16, #tpu.memory_space<vmem>>, %arg2: memref<1x128xf32, #tpu.memory_space<vmem>>, %arg3: memref<128x128xbf16, #tpu.memory_space<vmem>>, %arg4: memref<1x128xf32, #tpu.memory_space<vmem>>, %arg5: memref<128x128xbf16, #tpu.memory_space<vmem>>, %arg6: memref<1x128xf32, #tpu.memory_space<vmem>>, %arg7: memref<8x128xf32, #tpu.memory_space<vmem>>) attributes {dimension_semantics = [], scalar_prefetch = 0 : i64, scratch_operands = 0 : i64, tpu.core_type = #tpu.core_type<tc>} {
    %c0 = arith.constant 0 : index
    %c0_0 = arith.constant 0 : index
    %0 = vector.load %arg0[%c0, %c0_0] : memref<8x32xf32, #tpu.memory_space<vmem>>, vector<8x32xf32>
    %c0_1 = arith.constant 0 : index
    %c0_2 = arith.constant 0 : index
    %1 = vector.load %arg1[%c0_1, %c0_2] : memref<32x128xbf16, #tpu.memory_space<vmem>>, vector<32x128xbf16>
    %c0_3 = arith.constant 0 : index
    %c0_4 = arith.constant 0 : index
    %2 = vector.load %arg2[%c0_3, %c0_4] : memref<1x128xf32, #tpu.memory_space<vmem>>, vector<1x128xf32>
    %3 = arith.truncf %0 : vector<8x32xf32> to vector<8x32xbf16>
    %cst = arith.constant dense<0.000000e+00> : vector<8x128xf32>
    %4 = tpu.matmul %3, %1, %cst {dimension_numbers = #tpu.dot_dimension_numbers<[1], [0], [0], [1], [0, 0, 1, 1], [], []>} : vector<8x32xbf16>, vector<32x128xbf16>, vector<8x128xf32> -> vector<8x128xf32>
    %5 = vector.broadcast %2 : vector<1x128xf32> to vector<8x128xf32>
    %6 = arith.addf %4, %5 : vector<8x128xf32>
    %cst_5 = arith.constant 0.000000e+00 : f32
    %7 = vector.broadcast %cst_5 : f32 to vector<8x128xf32>
    %8 = arith.maximumf %6, %7 : vector<8x128xf32>
    %c0_6 = arith.constant 0 : index
    %c0_7 = arith.constant 0 : index
    %9 = vector.load %arg3[%c0_6, %c0_7] : memref<128x128xbf16, #tpu.memory_space<vmem>>, vector<128x128xbf16>
    %c0_8 = arith.constant 0 : index
    %c0_9 = arith.constant 0 : index
    %10 = vector.load %arg4[%c0_8, %c0_9] : memref<1x128xf32, #tpu.memory_space<vmem>>, vector<1x128xf32>
    %11 = arith.truncf %8 : vector<8x128xf32> to vector<8x128xbf16>
    %cst_10 = arith.constant dense<0.000000e+00> : vector<8x128xf32>
    %12 = tpu.matmul %11, %9, %cst_10 {dimension_numbers = #tpu.dot_dimension_numbers<[1], [0], [0], [1], [0, 0, 1, 1], [], []>} : vector<8x128xbf16>, vector<128x128xbf16>, vector<8x128xf32> -> vector<8x128xf32>
    %13 = vector.broadcast %10 : vector<1x128xf32> to vector<8x128xf32>
    %14 = arith.addf %12, %13 : vector<8x128xf32>
    %cst_11 = arith.constant 0.000000e+00 : f32
    %15 = vector.broadcast %cst_11 : f32 to vector<8x128xf32>
    %16 = arith.maximumf %14, %15 : vector<8x128xf32>
    %c0_12 = arith.constant 0 : index
    %c0_13 = arith.constant 0 : index
    %17 = vector.load %arg5[%c0_12, %c0_13] : memref<128x128xbf16, #tpu.memory_space<vmem>>, vector<128x128xbf16>
    %c0_14 = arith.constant 0 : index
    %c0_15 = arith.constant 0 : index
    %18 = vector.load %arg6[%c0_14, %c0_15] : memref<1x128xf32, #tpu.memory_space<vmem>>, vector<1x128xf32>
    %19 = arith.truncf %16 : vector<8x128xf32> to vector<8x128xbf16>
    %cst_16 = arith.constant dense<0.000000e+00> : vector<8x128xf32>
    %20 = tpu.matmul %19, %17, %cst_16 {dimension_numbers = #tpu.dot_dimension_numbers<[1], [0], [0], [1], [0, 0, 1, 1], [], []>} : vector<8x128xbf16>, vector<128x128xbf16>, vector<8x128xf32> -> vector<8x128xf32>
    %21 = vector.broadcast %18 : vector<1x128xf32> to vector<8x128xf32>
    %22 = arith.addf %20, %21 : vector<8x128xf32>
    %cst_17 = arith.constant 0.000000e+00 : f32
    %23 = vector.broadcast %cst_17 : f32 to vector<8x128xf32>
    %24 = arith.maximumf %22, %23 : vector<8x128xf32>
    %c0_18 = arith.constant 0 : index
    %c0_19 = arith.constant 0 : index
    %25 = vector.load %arg7[%c0_18, %c0_19] : memref<8x128xf32, #tpu.memory_space<vmem>>, vector<8x128xf32>
    tpu.vector_store %arg7[%c0_18, %c0_19], %24 {strides = array<i32>} : memref<8x128xf32, #tpu.memory_space<vmem>>, vector<8x128xf32>,
    return
  }
}

</mosaic_0001>

<bundles_post_ra>
// kernel: tpu_custom_call.1
= control target key start
LH: loop header
LB: loop body
LE: loop exit
PB: predicated region body
PF: predicated region fallthrough
CT: control target
= control target key end

     0   :  { %12 = vsyncpa [#allocation3], 0  ;;  %s615_s0 = inlined_call_operand.hbm [shape: f32[8,32], index: 0, kind: input, shape index: {}]   ;;  %s616_s1 = inlined_call_operand.hbm [shape: bf16[32,128], index: 1, kind: input, shape index: {}]   ;;  %s617_s2 = inlined_call_operand.vmem [shape: f32[1,128], index: 2, kind: input, shape index: {}]   ;;  %s618_s3 = inlined_call_operand.hbm [shape: bf16[128,128], index: 3, kind: input, shape index: {}]   ;;  %s619_s4 = inlined_call_operand.vmem [shape: f32[1,128], index: 4, kind: input, shape index: {}]   ;;  %s620_s5 = inlined_call_operand.hbm [shape: bf16[128,128], index: 5, kind: input, shape index: {}]   ;;  %s621_s6 = inlined_call_operand.vmem [shape: f32[1,128], index: 6, kind: input, shape index: {}]   ;;  %s622_s7 = inlined_call_operand.hbm [shape: f32[8,128], index: 7, kind: output, shape index: {}]  }
   0x1   :  { %13 = vsyncpa [#allocation6], 0 }
   0x2   :  { %14 = vsyncpa [#allocation9], 0  ;;  %s31_s26 = sshll.u32 %s616_s1, 4  ;;  %s32_s26 = int_to_ptr.hbm [resolvable:$true] %s31_s26 }
   0x3   :  { %15 = vsyncpa [#allocation4], 0  ;;  %s544_s27 = smov [#allocation5]   ;;  %s21_s8 = sshll.u32 %s615_s0, 4  ;;  %s22_s8 = int_to_ptr.hbm [resolvable:$true] %s21_s8 }
   0x4   :  { %s33_s28 = sshll.u32 %s544_s27, 4  ;;  %s545_s9 = smov 64   ;;  %s34_s28 = int_to_ptr.vmem [resolvable:$true] %s33_s28 }
   0x5   :  { %s546_s10 = smov 4   ;;  %s547_s11 = smov [#allocation2]  }
   0x6   :  { %39 = dma.hbm_to_vmem [thread:$0]  %s32_s26, 256, %s34_s28, [#allocation6], %s545_s9, %s545_s9, %s546_s10  }
   0x7   :  { %s23_s12 = sshll.u32 %s547_s11, 4  ;;  %s46_s15 = sshll.u32 %s618_s3, 4  ;;  %s24_s12 = int_to_ptr.vmem [resolvable:$true] %s23_s12  ;;  %s47_s15 = int_to_ptr.hbm [resolvable:$true] %s46_s15 }
   0x8   :  { %26 = dma.hbm_to_vmem [thread:$0]  %s22_s8, 128, %s24_s12, [#allocation3]  }
   0x9   :  { %s61_s17 = sshll.u32 %s620_s5, 4  ;;  %s548_s18 = smov [#allocation7]   ;;  %s62_s17 = int_to_ptr.hbm [resolvable:$true] %s61_s17 }
   0xa   :  { %s48_s19 = sshll.u32 %s548_s18, 4  ;;  %s549_s0 = smov [#allocation8]   ;;  %s49_s19 = int_to_ptr.vmem [resolvable:$true] %s48_s19 }
   0xb   :  { %54 = dma.hbm_to_vmem [thread:$0]  %s47_s15, 1024, %s49_s19, [#allocation6], %s545_s9, %s545_s9, %s546_s10  }
   0xc   :  { %s63_s20 = sshll.u32 %s549_s0, 4  ;;  %s64_s20 = int_to_ptr.vmem [resolvable:$true] %s63_s20 }
   0xd   :  { %69 = dma.hbm_to_vmem [thread:$0]  %s62_s17, 1024, %s64_s20, [#allocation9], %s545_s9, %s545_s9, %s546_s10  }
   0xe   :  { %536 = dma.done.wait [#allocation3], 128  }
   0xf   :  { %537 = vsyncadd [#allocation3], 4294967168 }
  0x10   :  { %538 = dma.done.wait [#allocation6], 1280  }
  0x11   :  { %539 = vsyncadd [#allocation6], 4294966016 }
  0x12   :  { %540 = dma.done.wait [#allocation9], 1024  }
  0x13   :  { %541 = vsyncadd [#allocation9], 4294966272  ;;  %v389_v0 = vld [vmem:[#allocation5 + $0x8] sm:$0xff]  ;;  %v388_v2 = vld [vmem:[#allocation5] sm:$0xff]  ;;  %vm111_vm0 = vcmask 261120   ;;  %s550_s24 = smov [#allocation10]  }
  0x14   :  { %v397_v1 = vld [vmem:[#allocation7 + $0x38] sm:$0xff]  ;;  %121 = vmatpush.bf16.msra.mxu0 %v389_v0  ;;  %v89_v3 = vld [vmem:[#allocation2] sm:$0xff]  ;;  %v396_v4 = vld [vmem:[#allocation7 + $0x30] sm:$0xff]  ;;  %s301_s25 = sshll.u32 %s550_s24, 4  ;;  %s303_s28 = sshll.u32 %s622_s7, 4  ;;  %s302_s25 = int_to_ptr.vmem [resolvable:$true] %s301_s25  ;;  %s304_s28 = int_to_ptr.hbm [resolvable:$true] %s303_s28 }
  0x15   :  { %198 = vmatpush.bf16.msra.mxu1 %v397_v1  ;;  %v95_v5 = vpack.c.bf16 %v89_v3, %v89_v3  ;;  %v395_v6 = vld [vmem:[#allocation7 + $0x28] sm:$0xff]  ;;  %v394_v7 = vld [vmem:[#allocation7 + $0x20] sm:$0xff]  ;;  %v393_v8 = vld [vmem:[#allocation7 + $0x18] sm:$0xff] }
  0x16   :  { %v392_v9 = vld [vmem:[#allocation7 + $0x10] sm:$0xff]  ;;  %v391_v10 = vld [vmem:[#allocation7 + $0x8] sm:$0xff]  ;;  %v390_v11 = vld [vmem:[#allocation7] sm:$0xff] }
  0x17   :  { %v405_v12 = vld [vmem:[#allocation8 + $0x38] sm:$0xff]  ;;  %v404_v13 = vld [vmem:[#allocation8 + $0x30] sm:$0xff]  ;;  %v403_v14 = vld [vmem:[#allocation8 + $0x28] sm:$0xff] }
  0x18   :  { %122 = vmatpush.bf16.msra.mxu0 %v388_v2  ;;  %281 = vmatpush.bf16.msra.mxu2 %v405_v12  ;;  %v402_v15 = vld [vmem:[#allocation8 + $0x20] sm:$0xff]  ;;  %v401_v16 = vld [vmem:[#allocation8 + $0x18] sm:$0xff]  ;;  %v400_v17 = vld [vmem:[#allocation8 + $0x10] sm:$0xff] }
  0x19   :  { %199 = vmatpush.bf16.msra.mxu1 %v396_v4  ;;  %v413_v18 = vld [vmem:[%s617_s2] ss:$0 sm:$0xff]  ;;  %v398_v25 = vld [vmem:[#allocation8] sm:$0xff] }
  0x1a   :  { %v399_v24 = vld [vmem:[#allocation8 + $0x8] sm:$0xff] }
  0x1b   :  { %323 = vmatmul.msk.bf16.vlgmr.msra.gmra.mxu0 %vm111_vm0, %v95_v5  ;;  %v414_v26 = vld [vmem:[%s619_s4] ss:$0 sm:$0xff] }
  0x1c   :  { %282 = vmatpush.bf16.msra.mxu2 %v404_v13  ;;  %v415_v32 = vld [vmem:[%s621_s6] ss:$0 sm:$0xff] }
  0x1d   :  { %200 = vmatpush.bf16.msra.mxu1 %v395_v6 }
  0x20   :  { %283 = vmatpush.bf16.msra.mxu2 %v403_v14 }
  0x21   :  { %201 = vmatpush.bf16.msra.mxu1 %v394_v7 }
  0x24   :  { %284 = vmatpush.bf16.msra.mxu2 %v402_v15 }
  0x25   :  { %202 = vmatpush.bf16.msra.mxu1 %v393_v8 }
  0x28   :  { %285 = vmatpush.bf16.msra.mxu2 %v401_v16 }
  0x29   :  { %203 = vmatpush.bf16.msra.mxu1 %v392_v9 }
  0x2c   :  { %286 = vmatpush.bf16.msra.mxu2 %v400_v17 }
  0x2d   :  { %204 = vmatpush.bf16.msra.mxu1 %v391_v10 }
  0x30   :  { %287 = vmatpush.bf16.msra.mxu2 %v399_v24 }
  0x31   :  { %205 = vmatpush.bf16.msra.mxu1 %v390_v11 }
  0x34   :  { %288 = vmatpush.bf16.msra.mxu2 %v398_v25 }
  0x98   :  { %v124_v19 = vpop.f32.mrf.mxu0 }
  0x99   :  { %v125_v20 = vadd.f32 %v413_v18, %v124_v19 }
  0x9b   :  { %v128_v21 = vmax.f32 %v125_v20, 0.0 }
  0x9d   :  { %v146_v22 = vpack.c.bf16 %v128_v21, %v128_v21 }
  0x9f   :  { %206 = vmatmul.bf16.vlgmr.msra.gmra.mxu1 %v146_v22 }
  0xa0   :  { %v126_v23 = vpop.f32.mrf.mxu0 }
 0x11c   :  { %v207_v27 = vpop.f32.mrf.mxu1 }
 0x11d   :  { %v208_v28 = vadd.f32 %v414_v26, %v207_v27 }
 0x11f   :  { %v211_v29 = vmax.f32 %v208_v28, 0.0 }
 0x121   :  { %v229_v30 = vpack.c.bf16 %v211_v29, %v211_v29 }
 0x123   :  { %289 = vmatmul.bf16.vlgmr.msra.gmra.mxu2 %v229_v30 }
 0x124   :  { %v209_v31 = vpop.f32.mrf.mxu1 }
 0x1a6   :  { %v290_v33 = vpop.f32.mrf.mxu2 }
 0x1a7   :  { %v291_v34 = vadd.f32 %v415_v32, %v290_v33 }
 0x1a9   :  { %v294_v35 = vmax.f32 %v291_v34, 0.0 }
 0x1ab   :  { %295 = vst [vmem:[#allocation10] sm:$0xff] %v294_v35 }
 0x1ac   :  { %306 = dma.vmem_to_hbm [thread:$0]  %s302_s25, 128, %s304_s28, [#allocation4]  }
 0x1ae   :  { %v292_v36 = vpop.f32.mrf.mxu2 }
 0x1af   :  { %542 = dma.done.wait [#allocation4], 128  }
 0x1b0   :  { %543 = vsyncadd [#allocation4], 4294967168 }
 0x1b1   :  { %311 = vsyncpa [#allocation3], 1 }
 0x1b2   :  { %312 = vsyncpa [#allocation6], 1 }
 0x1b3   :  { %313 = vsyncpa [#allocation9], 1 }
 0x1b4   :  { %314 = vsyncpa [#allocation4], 1 }

</bundles_post_ra>
